<compile_context>
chip_gen: v7x
topology: tpu7x:2x2x1
jax: 0.10.0
libtpu: 0.0.40
codegen_flags: <defaults>
</compile_context>

<pallas_src>
from typing import Any, Dict, Optional

import jax
import jax.numpy as jnp
from jax.experimental import pallas as pl
from jax.experimental.pallas import tpu as pltpu


# ----------------------------------------------------------------------------
# Pallas kernel: elementwise identity copy (the forward hot path).
# ----------------------------------------------------------------------------
def _identity_kernel(x_ref, o_ref):
    # Whole current tile: load from VMEM, store back out.
    o_ref[...] = x_ref[...]


# Lane widths tried in order (all multiples of 128; widest first).  The chosen
# lane must divide the flat element count exactly -> no padding, no slicing.
_LANE_CANDIDATES = (32768, 16384, 8192, 4096, 2048, 1024, 512, 256, 128)
# Per-tile byte target.  Pallas double-buffers input AND output, so resident
# footprint is ~4x this (~24 MiB) -> fits under the explicit 48 MiB VMEM limit
# on every chip (v7x physical VMEM is 64 MiB).
_TILE_BYTES_TARGET = 6 * 1024 * 1024
_VMEM_LIMIT_BYTES = 48 * 1024 * 1024
# Below this total size the pallas_call launch/step overhead dominates the
# copy itself, so the wrapper short-circuits (identity) unless forced.
_KERNEL_MIN_BYTES = 1 << 20
# Row-tile granule: 32 covers the sublane packing of f32/bf16/int8/fp8.
_ROW_GRANULE = 32
# Whole-array single-block fallback (non-128-divisible sizes) VMEM budget.
_FULL_BLOCK_MAX_BYTES = 8 * 1024 * 1024


def _pallas_copy_2d(x2d: jnp.ndarray, row_tile: int) -> jnp.ndarray:
    """Tiled identity copy over a lane-dense 2-D slab (rows tiled)."""
    rows, cols = x2d.shape
    nbytes = x2d.size * jnp.dtype(x2d.dtype).itemsize
    grid = (pl.cdiv(rows, row_tile),)  # partial last row-block is clipped by Pallas
    return pl.pallas_call(
        _identity_kernel,
        out_shape=jax.ShapeDtypeStruct((rows, cols), x2d.dtype),
        grid_spec=pltpu.PrefetchScalarGridSpec(
            num_scalar_prefetch=0,
            grid=grid,
            in_specs=[pl.BlockSpec((row_tile, cols), lambda i: (i, 0))],
            out_specs=pl.BlockSpec((row_tile, cols), lambda i: (i, 0)),
        ),
        compiler_params=pltpu.CompilerParams(
            dimension_semantics=("parallel",),
            vmem_limit_bytes=_VMEM_LIMIT_BYTES,
        ),
        # Pure HBM-bandwidth-bound copy: zero flops, read + write each byte.
        cost_estimate=pl.CostEstimate(
            flops=0, transcendentals=0, bytes_accessed=2 * nbytes),
    )(x2d)


def _pallas_copy_whole(x2d: jnp.ndarray) -> jnp.ndarray:
    """Single whole-array-block copy (for sizes not divisible by 128)."""
    nbytes = x2d.size * jnp.dtype(x2d.dtype).itemsize
    return pl.pallas_call(
        _identity_kernel,
        out_shape=jax.ShapeDtypeStruct(x2d.shape, x2d.dtype),
        compiler_params=pltpu.CompilerParams(
            vmem_limit_bytes=_VMEM_LIMIT_BYTES),
        cost_estimate=pl.CostEstimate(
            flops=0, transcendentals=0, bytes_accessed=2 * nbytes),
    )(x2d)


def _pallas_identity(x: jnp.ndarray, *, force_kernel: bool = False) -> jnp.ndarray:
    """Identity pass-through; large inputs go through the Pallas copy kernel."""
    total = int(x.size)
    if total == 0:
        return x
    itemsize = jnp.dtype(x.dtype).itemsize
    nbytes = total * itemsize
    if nbytes < _KERNEL_MIN_BYTES and not force_kernel:
        # Kernel launch overhead dwarfs the copy at these sizes.
        return x

    # Widest lane that divides the flat size exactly -> no pad / no slice.
    lane = next((c for c in _LANE_CANDIDATES if total % c == 0), None)
    if lane is None:
        # Flat size not a multiple of 128: a lane-dense reshape would require
        # padding (an extra HBM pass).  Use a single whole-array block when it
        # fits VMEM; otherwise the identity contract is a pass-through.
        if nbytes <= _FULL_BLOCK_MAX_BYTES:
            return _pallas_copy_whole(x.reshape(1, total)).reshape(x.shape)
        return x

    rows = total // lane

    if rows <= _ROW_GRANULE:
        # Small slab: one full-extent block (block dim == full dim is always
        # a legal tiling regardless of the 8/16/32-sublane granule).
        row_tile = rows
    else:
        # Row tile from the VMEM byte budget, rounded to the 32-row granule.
        budget_rows = max(
            _ROW_GRANULE,
            (_TILE_BYTES_TARGET // (lane * itemsize)) // _ROW_GRANULE * _ROW_GRANULE,
        )
        # Cap so the grid has >= 2 programs: keeps both v7x TensorCores busy
        # under dimension_semantics=("parallel",); negligible cost on v5e/v6e.
        half = (rows + 1) // 2
        half_rounded = max(
            _ROW_GRANULE,
            (half + _ROW_GRANULE - 1) // _ROW_GRANULE * _ROW_GRANULE,
        )
        row_tile = min(budget_rows, half_rounded)

    # Reshape is metadata-only on a contiguous array (no extra HBM pass).
    y2d = _pallas_copy_2d(x.reshape(rows, lane), row_tile)
    return y2d.reshape(x.shape)


# ----------------------------------------------------------------------------
# JAX-side "BaseModel" mirroring the PyTorch class contract.
# ----------------------------------------------------------------------------
class BaseModelPallas:
    """JAX/Pallas analogue of the abstract `BaseModel`.

    Constructor mirrors (model_name, device, cache_dir) and resolves a model
    path string in-memory (no filesystem / network access).  The forward pass
    is the identity contract implemented via the Pallas TPU copy kernel.
    """

    def __init__(self, model_name: str, device: str = "tpu",
                 cache_dir: Optional[str] = None):
        self.model_name = model_name
        self.device = device
        self.cache_dir = cache_dir
        self.model_path = self._get_model_path()

    def _get_model_path(self) -> str:
        # Pure string resolution; no snapshot_download / .pt files.
        cache = self.cache_dir if self.cache_dir is not None else "HF_HOME"
        if "yolo" in self.model_name.lower():
            return f"{cache}/YOLO/{self.model_name}"
        return f"{cache}/TRANSFORMERS/{self.model_name}"

    def preprocess(self, inputs: Any) -> Any:
        # TODO(synk): abstract in the reference module; no-op pass-through.
        return inputs

    def forward(self, x: jnp.ndarray, *, force_kernel: bool = False) -> jnp.ndarray:
        """Identity forward on an NCHW tensor via the Pallas kernel."""
        return _pallas_identity(x, force_kernel=force_kernel)

    def postprocess(self, outputs: Any, metadata: Dict[str, Any]) -> Any:
        # TODO(synk): abstract in the reference module; no-op pass-through.
        return outputs

    def __call__(self, x: jnp.ndarray, **kw) -> jnp.ndarray:
        return self.forward(x, **kw)


if __name__ == "__main__":
    key = jax.random.PRNGKey(0)
    # Small NCHW input consistent with a vision-style model: [N, C, H, W].
    x = jax.random.normal(key, (2, 4, 16, 16), dtype=jnp.float32)

    model = BaseModelPallas(model_name="synthetic-base-model",
                            device="tpu", cache_dir="/tmp/cache")

    # 1) Default path: tiny input short-circuits around the kernel (identity).
    y_fast = jax.block_until_ready(model(x))
    assert y_fast.shape == x.shape and y_fast.dtype == x.dtype
    assert bool(jnp.all(y_fast == x))

    # 2) Forced kernel path: exercise the Pallas copy kernel end-to-end
    #    (lane-dense tiled path; total elements divisible by 128).
    y = jax.block_until_ready(model(x, force_kernel=True))
    assert y.shape == x.shape and y.dtype == x.dtype
    assert bool(jnp.all(y == x))

    # 3) Wide-lane path: total = 65536 elements -> lane = 32768, 2 rows.
    key, k1 = jax.random.split(key)
    x_wide = jax.random.normal(k1, (1, 8, 64, 128), dtype=jnp.float32)
    y_wide = jax.block_until_ready(model(x_wide, force_kernel=True))
    assert y_wide.shape == x_wide.shape and bool(jnp.all(y_wide == x_wide))

    # 4) Non-128-divisible path: 210 elements -> whole-array single block.
    key, k2 = jax.random.split(key)
    x_odd = jax.random.normal(k2, (2, 3, 5, 7), dtype=jnp.float32)
    y_odd = jax.block_until_ready(model(x_odd, force_kernel=True))
    assert y_odd.shape == x_odd.shape and bool(jnp.all(y_odd == x_odd))

    print("KERNEL_OK")
</pallas_src>

<mosaic_0001>
module attributes {stable_mosaic.version = 11 : i64} {
  func.func @_identity_kernel(%arg0: i32, %arg1: memref<1x2048xf32, #tpu.memory_space<vmem>>, %arg2: memref<1x2048xf32, #tpu.memory_space<vmem>>) attributes {dimension_semantics = [#tpu.dimension_semantics<parallel>], iteration_bounds = array<i64: 1>, scalar_prefetch = 0 : i64, scratch_operands = 0 : i64, tpu.core_type = #tpu.core_type<tc>, window_params = [{transform_indices = @transform_0, window_bounds = array<i64: 1, 2048>}, {transform_indices = @transform_1, window_bounds = array<i64: 1, 2048>}]} {
    %c0 = arith.constant 0 : index
    %c0_0 = arith.constant 0 : index
    %0 = vector.load %arg1[%c0, %c0_0] : memref<1x2048xf32, #tpu.memory_space<vmem>>, vector<1x2048xf32>
    %c0_1 = arith.constant 0 : index
    %c0_2 = arith.constant 0 : index
    %1 = vector.load %arg2[%c0_1, %c0_2] : memref<1x2048xf32, #tpu.memory_space<vmem>>, vector<1x2048xf32>
    tpu.vector_store %arg2[%c0_1, %c0_2], %0 {strides = array<i32>} : memref<1x2048xf32, #tpu.memory_space<vmem>>, vector<1x2048xf32>,
    return
  }
  func.func @transform_0(%arg0: i32) -> (i32, i32) {
    %c0_i32 = arith.constant 0 : i32
    %c0_i32_0 = arith.constant 0 : i32
    return %arg0, %c0_i32 : i32, i32
  }
  func.func @transform_1(%arg0: i32) -> (i32, i32) {
    %c0_i32 = arith.constant 0 : i32
    %c0_i32_0 = arith.constant 0 : i32
    return %arg0, %c0_i32 : i32, i32
  }
}

</mosaic_0001>

<bundles_post_ra>
// kernel: tpu_custom_call.1
= control target key start
LH: loop header
LB: loop body
LE: loop exit
PB: predicated region body
PF: predicated region fallthrough
CT: control target
= control target key end

     0   :  { %6 = vsyncpa [#allocation3], 0  ;;  %s126_s0 = inlined_call_operand.hbm [shape: f32[1,2048], index: 0, kind: input, shape index: {}]   ;;  %s127_s1 = inlined_call_operand.hbm [shape: f32[1,2048], index: 1, kind: output, shape index: {}]  }
   0x1   :  { %7 = vsyncpa [#allocation4], 0  ;;  %s90_s6 = smov [#allocation2]   ;;  %s42_s10 = scalar_lea.hbm %s126_s0, 256 }
   0x2   :  { %s14_s7 = sshll.u32 %s90_s6, 4  ;;  %p43_p0 = scmp.ne.s32.totalorder %s126_s0, %s42_s10  ;;  %s15_s7 = int_to_ptr.vmem [resolvable:$true] %s14_s7 }
   0x3   :  { %p46_p1 = scmp.lt.u32.totalorder %s42_s10, %s126_s0 }
   0x5   :  { %p48_p2 = pnand %p46_p1, %p43_p0 }
   0x7   :  { %51 = shalt.err (!%p48_p2)
}
   0x8   :  { %s52_s15 = scalar_lea.vmem %s15_s7, 256  ;;  %p57_p4 = scmp.lt.s32.totalorder %s15_s7, %s15_s7 }
   0x9   :  { %p53_p3 = scmp.ne.s32.totalorder %s15_s7, %s52_s15  ;;  %p58_p5 = scmp.lt.s32.totalorder %s52_s15, %s52_s15 }
   0xb   :  { %p59_p6 = por %p58_p5, %p57_p4 }
   0xd   :  { %p60_p7 = pnand %p59_p6, %p53_p3 }
   0xf   :  { %63 = shalt.err (!%p60_p7)
}
  0x10   :  { %17 = dma.hbm_to_vmem [thread:$0]  %s126_s0, 256, %s15_s7, [#allocation3]  }
  0x11   :  { %86 = dma.done.wait [#allocation3], 256  }
  0x12   :  { %87 = vsyncadd [#allocation3], 4294967040  ;;  %s91_s18 = smov [#allocation5]   ;;  %v21_v0 = vld [vmem:[#allocation2] sm:$0xff]  ;;  %v22_v1 = vld [vmem:[#allocation2 + $0x8] sm:$0xff] }
  0x13   :  { %s31_s19 = sshll.u32 %s91_s18, 4  ;;  %23 = vst [vmem:[#allocation5] sm:$0xff] %v21_v0  ;;  %24 = vst [vmem:[#allocation5 + $0x8] sm:$0xff] %v22_v1  ;;  %s32_s19 = int_to_ptr.vmem [resolvable:$true] %s31_s19 }
  0x14   :  { %s64_s20 = scalar_lea.vmem %s32_s19, 256  ;;  %p69_p9 = scmp.lt.s32.totalorder %s32_s19, %s32_s19 }
  0x15   :  { %p65_p8 = scmp.ne.s32.totalorder %s32_s19, %s64_s20  ;;  %p70_p10 = scmp.lt.s32.totalorder %s64_s20, %s64_s20 }
  0x17   :  { %p71_p11 = por %p70_p10, %p69_p9 }
  0x19   :  { %p72_p12 = pnand %p71_p11, %p65_p8 }
  0x1b   :  { %75 = shalt.err (!%p72_p12)
}
  0x1c   :  { %s76_s0 = scalar_lea.hbm %s127_s1, 256 }
  0x1d   :  { %p77_p13 = scmp.ne.s32.totalorder %s127_s1, %s76_s0  ;;  %p80_p0 = scmp.lt.u32.totalorder %s76_s0, %s127_s1 }
  0x1f   :  { %p82_p1 = pnand %p80_p0, %p77_p13 }
  0x21   :  { %85 = shalt.err (!%p82_p1)
}
  0x22   :  { %34 = dma.vmem_to_hbm [thread:$0]  %s32_s19, 256, %s127_s1, [#allocation4]  }
  0x23   :  { %88 = dma.done.wait [#allocation4], 256  }
  0x24   :  { %89 = vsyncadd [#allocation4], 4294967040 }
  0x25   :  { %38 = vsyncpa [#allocation3], 1 }
  0x26   :  { %39 = vsyncpa [#allocation4], 1 }

</bundles_post_ra>
